<compile_context>
chip_gen: v7x
topology: tpu7x:2x2x1
jax: 0.10.0
libtpu: 0.0.40
codegen_flags: <defaults>
</compile_context>

<pallas_src>
import jax
import jax.numpy as jnp
from jax.experimental import pallas as pl
from jax.experimental.pallas import tpu as pltpu

STATE_DIM = 288
ACTION_SPACE = 12
HIDDEN = 256


def _forward_kernel(s_ref, a_ref, w1s_ref, w1a_ref, b1_ref, w2_ref, b2_ref, o_ref):
    # s_ref: (TB, 288) bf16   a_ref: (TB, 12) bf16
    # w1s_ref: (288, 256) bf16   w1a_ref: (12, 256) bf16   b1_ref: (1, 256) f32
    # w2_ref: (256, 288) bf16    b2_ref: (1, 288) f32      o_ref: (TB, 288) f32
    h = jnp.dot(s_ref[...], w1s_ref[...], preferred_element_type=jnp.float32)
    h = h + jnp.dot(a_ref[...], w1a_ref[...], preferred_element_type=jnp.float32)
    h = jnp.maximum(h + b1_ref[...], 0.0)                        # ReLU
    y = jnp.dot(h.astype(jnp.bfloat16), w2_ref[...],
                preferred_element_type=jnp.float32)
    o_ref[...] = (y + b2_ref[...]).astype(o_ref.dtype)


def _round_up(x, m):
    return ((x + m - 1) // m) * m


def forward_module(state, action, params, *, tb=256):
    """state: (B, 288) f32, action: (B, 12) f32 -> (B, 288) f32."""
    w1, b1, w2, b2 = params  # w1: (300,256), b1: (1,256), w2: (256,288), b2: (1,288)
    B = state.shape[0]

    # Pre-split W1 so no (B,300) concat is materialized; bf16 for the MXU.
    w1_s = w1[:STATE_DIM].astype(jnp.bfloat16)        # (288, 256)
    w1_a = w1[STATE_DIM:].astype(jnp.bfloat16)        # (12, 256)
    w2b = w2.astype(jnp.bfloat16)                     # (256, 288)
    s = state.astype(jnp.bfloat16)
    a = action.astype(jnp.bfloat16)

    # Batch tiling: TB multiple of 8 sublanes; pad B up to a multiple of TB.
    TB = min(tb, _round_up(B, 8))
    Bp = _round_up(B, TB)
    if Bp != B:
        s = jnp.pad(s, ((0, Bp - B), (0, 0)))
        a = jnp.pad(a, ((0, Bp - B), (0, 0)))
    grid = (Bp // TB,)

    flops = 2 * Bp * ((STATE_DIM + ACTION_SPACE) * HIDDEN + HIDDEN * STATE_DIM)
    bytes_accessed = (
        s.size * 2 + a.size * 2                       # bf16 activations in
        + w1_s.size * 2 + w1_a.size * 2 + w2b.size * 2  # bf16 weights
        + b1.size * 4 + b2.size * 4                   # f32 biases
        + Bp * STATE_DIM * 4                          # f32 output
    )

    out = pl.pallas_call(
        _forward_kernel,
        out_shape=jax.ShapeDtypeStruct((Bp, STATE_DIM), jnp.float32),
        grid_spec=pltpu.PrefetchScalarGridSpec(
            num_scalar_prefetch=0,
            grid=grid,
            in_specs=[
                pl.BlockSpec((TB, STATE_DIM), lambda i: (i, 0)),     # state tile
                pl.BlockSpec((TB, ACTION_SPACE), lambda i: (i, 0)),  # action tile
                pl.BlockSpec(w1_s.shape, lambda i: (0, 0)),          # resident weights
                pl.BlockSpec(w1_a.shape, lambda i: (0, 0)),
                pl.BlockSpec(b1.shape, lambda i: (0, 0)),
                pl.BlockSpec(w2b.shape, lambda i: (0, 0)),
                pl.BlockSpec(b2.shape, lambda i: (0, 0)),
            ],
            out_specs=pl.BlockSpec((TB, STATE_DIM), lambda i: (i, 0)),
        ),
        compiler_params=pltpu.CompilerParams(
            dimension_semantics=("parallel",),          # shard batch over TCs (v7x)
            vmem_limit_bytes=32 * 1024 * 1024,
        ),
        cost_estimate=pl.CostEstimate(
            flops=flops, transcendentals=0, bytes_accessed=bytes_accessed),
    )(s, a, w1_s, w1_a, b1, w2b, b2)

    return out[:B]


def init_params(key, action_space=ACTION_SPACE):
    """Deterministic init matching nn.Linear default (uniform +-1/sqrt(fan_in)).
    Weights stored as (in_features, out_features), i.e. transposed vs PyTorch."""
    in1 = STATE_DIM + action_space
    k1, k2, k3, k4 = jax.random.split(key, 4)
    bound1 = 1.0 / jnp.sqrt(in1)
    bound2 = 1.0 / jnp.sqrt(HIDDEN)
    w1 = jax.random.uniform(k1, (in1, HIDDEN), jnp.float32, -bound1, bound1)
    b1 = jax.random.uniform(k2, (1, HIDDEN), jnp.float32, -bound1, bound1)
    w2 = jax.random.uniform(k3, (HIDDEN, STATE_DIM), jnp.float32, -bound2, bound2)
    b2 = jax.random.uniform(k4, (1, STATE_DIM), jnp.float32, -bound2, bound2)
    return (w1, b1, w2, b2)


def _reference(state, action, params):
    """Reference mirroring the kernel's bf16-input / f32-accumulate quantization."""
    w1, b1, w2, b2 = params
    s = state.astype(jnp.bfloat16)
    a = action.astype(jnp.bfloat16)
    w1s = w1[:STATE_DIM].astype(jnp.bfloat16)
    w1a = w1[STATE_DIM:].astype(jnp.bfloat16)
    h = (jnp.dot(s, w1s, preferred_element_type=jnp.float32)
         + jnp.dot(a, w1a, preferred_element_type=jnp.float32) + b1)
    h = jnp.maximum(h, 0.0)
    y = jnp.dot(h.astype(jnp.bfloat16), w2.astype(jnp.bfloat16),
                preferred_element_type=jnp.float32) + b2
    return y


if __name__ == "__main__":
    key = jax.random.PRNGKey(0)
    kp, ks, ka = jax.random.split(key, 3)

    B = 4
    params = init_params(kp)
    state = jax.random.normal(ks, (B, STATE_DIM), jnp.float32)
    # one-hot actions, like the ICM usage
    action_idx = jax.random.randint(ka, (B,), 0, ACTION_SPACE)
    action = jax.nn.one_hot(action_idx, ACTION_SPACE, dtype=jnp.float32)

    out = forward_module(state, action, params)
    out = jax.block_until_ready(out)

    ref = _reference(state, action, params)
    assert out.shape == (B, STATE_DIM)
    assert out.dtype == jnp.float32
    # bf16 matmul inputs (f32 accumulation) -> compare against matching-precision ref.
    assert jnp.allclose(out, ref, atol=2e-2, rtol=2e-2), "mismatch vs reference"

    print("KERNEL_OK")
</pallas_src>

<mosaic_0001>
module attributes {stable_mosaic.version = 11 : i64} {
  func.func @_forward_kernel(%arg0: i32, %arg1: memref<8x288xbf16, #tpu.memory_space<vmem>>, %arg2: memref<8x12xbf16, #tpu.memory_space<vmem>>, %arg3: memref<288x256xbf16, #tpu.memory_space<vmem>>, %arg4: memref<12x256xbf16, #tpu.memory_space<vmem>>, %arg5: memref<1x256xf32, #tpu.memory_space<vmem>>, %arg6: memref<256x288xbf16, #tpu.memory_space<vmem>>, %arg7: memref<1x288xf32, #tpu.memory_space<vmem>>, %arg8: memref<8x288xf32, #tpu.memory_space<vmem>>) attributes {dimension_semantics = [#tpu.dimension_semantics<parallel>], iteration_bounds = array<i64: 1>, scalar_prefetch = 0 : i64, scratch_operands = 0 : i64, tpu.core_type = #tpu.core_type<tc>, window_params = [{transform_indices = @transform_0, window_bounds = array<i64: 8, 288>}, {transform_indices = @transform_1, window_bounds = array<i64: 8, 12>}, {pipeline_mode = #tpu.pipeline_mode<synchronous>, transform_indices = @transform_2, window_bounds = array<i64: 288, 256>}, {pipeline_mode = #tpu.pipeline_mode<synchronous>, transform_indices = @transform_3, window_bounds = array<i64: 12, 256>}, {pipeline_mode = #tpu.pipeline_mode<synchronous>, transform_indices = @transform_4, window_bounds = array<i64: 1, 256>}, {pipeline_mode = #tpu.pipeline_mode<synchronous>, transform_indices = @transform_5, window_bounds = array<i64: 256, 288>}, {pipeline_mode = #tpu.pipeline_mode<synchronous>, transform_indices = @transform_6, window_bounds = array<i64: 1, 288>}, {transform_indices = @transform_7, window_bounds = array<i64: 8, 288>}]} {
    %c0 = arith.constant 0 : index
    %c0_0 = arith.constant 0 : index
    %0 = vector.load %arg1[%c0, %c0_0] : memref<8x288xbf16, #tpu.memory_space<vmem>>, vector<8x288xbf16>
    %c0_1 = arith.constant 0 : index
    %c0_2 = arith.constant 0 : index
    %1 = vector.load %arg3[%c0_1, %c0_2] : memref<288x256xbf16, #tpu.memory_space<vmem>>, vector<288x256xbf16>
    %cst = arith.constant dense<0.000000e+00> : vector<8x256xf32>
    %2 = tpu.matmul %0, %1, %cst {dimension_numbers = #tpu.dot_dimension_numbers<[1], [0], [0], [1], [0, 0, 1, 1], [], []>} : vector<8x288xbf16>, vector<288x256xbf16>, vector<8x256xf32> -> vector<8x256xf32>
    %c0_3 = arith.constant 0 : index
    %c0_4 = arith.constant 0 : index
    %3 = vector.load %arg2[%c0_3, %c0_4] : memref<8x12xbf16, #tpu.memory_space<vmem>>, vector<8x12xbf16>
    %c0_5 = arith.constant 0 : index
    %c0_6 = arith.constant 0 : index
    %4 = vector.load %arg4[%c0_5, %c0_6] : memref<12x256xbf16, #tpu.memory_space<vmem>>, vector<12x256xbf16>
    %cst_7 = arith.constant dense<0.000000e+00> : vector<8x256xf32>
    %5 = tpu.matmul %3, %4, %cst_7 {dimension_numbers = #tpu.dot_dimension_numbers<[1], [0], [0], [1], [0, 0, 1, 1], [], []>} : vector<8x12xbf16>, vector<12x256xbf16>, vector<8x256xf32> -> vector<8x256xf32>
    %6 = arith.addf %2, %5 : vector<8x256xf32>
    %c0_8 = arith.constant 0 : index
    %c0_9 = arith.constant 0 : index
    %7 = vector.load %arg5[%c0_8, %c0_9] : memref<1x256xf32, #tpu.memory_space<vmem>>, vector<1x256xf32>
    %8 = vector.broadcast %7 : vector<1x256xf32> to vector<8x256xf32>
    %9 = arith.addf %6, %8 : vector<8x256xf32>
    %cst_10 = arith.constant 0.000000e+00 : f32
    %10 = vector.broadcast %cst_10 : f32 to vector<8x256xf32>
    %11 = arith.maximumf %9, %10 : vector<8x256xf32>
    %12 = arith.truncf %11 : vector<8x256xf32> to vector<8x256xbf16>
    %c0_11 = arith.constant 0 : index
    %c0_12 = arith.constant 0 : index
    %13 = vector.load %arg6[%c0_11, %c0_12] : memref<256x288xbf16, #tpu.memory_space<vmem>>, vector<256x288xbf16>
    %cst_13 = arith.constant dense<0.000000e+00> : vector<8x288xf32>
    %14 = tpu.matmul %12, %13, %cst_13 {dimension_numbers = #tpu.dot_dimension_numbers<[1], [0], [0], [1], [0, 0, 1, 1], [], []>} : vector<8x256xbf16>, vector<256x288xbf16>, vector<8x288xf32> -> vector<8x288xf32>
    %c0_14 = arith.constant 0 : index
    %c0_15 = arith.constant 0 : index
    %15 = vector.load %arg7[%c0_14, %c0_15] : memref<1x288xf32, #tpu.memory_space<vmem>>, vector<1x288xf32>
    %16 = vector.broadcast %15 : vector<1x288xf32> to vector<8x288xf32>
    %17 = arith.addf %14, %16 : vector<8x288xf32>
    %c0_16 = arith.constant 0 : index
    %c0_17 = arith.constant 0 : index
    %18 = vector.load %arg8[%c0_16, %c0_17] : memref<8x288xf32, #tpu.memory_space<vmem>>, vector<8x288xf32>
    tpu.vector_store %arg8[%c0_16, %c0_17], %17 {strides = array<i32>} : memref<8x288xf32, #tpu.memory_space<vmem>>, vector<8x288xf32>,
    return
  }
  func.func @transform_0(%arg0: i32) -> (i32, i32) {
    %c0_i32 = arith.constant 0 : i32
    %c0_i32_0 = arith.constant 0 : i32
    return %arg0, %c0_i32 : i32, i32
  }
  func.func @transform_1(%arg0: i32) -> (i32, i32) {
    %c0_i32 = arith.constant 0 : i32
    %c0_i32_0 = arith.constant 0 : i32
    return %arg0, %c0_i32 : i32, i32
  }
  func.func @transform_2(%arg0: i32) -> (i32, i32) {
    %c0_i32 = arith.constant 0 : i32
    %c0_i32_0 = arith.constant 0 : i32
    %c0_i32_1 = arith.constant 0 : i32
    return %c0_i32, %c0_i32_0 : i32, i32
  }
  func.func @transform_3(%arg0: i32) -> (i32, i32) {
    %c0_i32 = arith.constant 0 : i32
    %c0_i32_0 = arith.constant 0 : i32
    %c0_i32_1 = arith.constant 0 : i32
    return %c0_i32, %c0_i32_0 : i32, i32
  }
  func.func @transform_4(%arg0: i32) -> (i32, i32) {
    %c0_i32 = arith.constant 0 : i32
    %c0_i32_0 = arith.constant 0 : i32
    %c0_i32_1 = arith.constant 0 : i32
    return %c0_i32, %c0_i32_0 : i32, i32
  }
  func.func @transform_5(%arg0: i32) -> (i32, i32) {
    %c0_i32 = arith.constant 0 : i32
    %c0_i32_0 = arith.constant 0 : i32
    %c0_i32_1 = arith.constant 0 : i32
    return %c0_i32, %c0_i32_0 : i32, i32
  }
  func.func @transform_6(%arg0: i32) -> (i32, i32) {
    %c0_i32 = arith.constant 0 : i32
    %c0_i32_0 = arith.constant 0 : i32
    %c0_i32_1 = arith.constant 0 : i32
    return %c0_i32, %c0_i32_0 : i32, i32
  }
  func.func @transform_7(%arg0: i32) -> (i32, i32) {
    %c0_i32 = arith.constant 0 : i32
    %c0_i32_0 = arith.constant 0 : i32
    return %arg0, %c0_i32 : i32, i32
  }
}

</mosaic_0001>

<bundles_post_ra>
// kernel: tpu_custom_call.1
= control target key start
LH: loop header
LB: loop body
LE: loop exit
PB: predicated region body
PF: predicated region fallthrough
CT: control target
= control target key end

     0   :  { %v1122_v2 = vmov 0   ;;  %vm81_vm0 = vcmask 1045504   ;;  %vm77_vm1 = vcmask 97280   ;;  %vm319_vm2 = vcmask 261120   ;;  %s1457_s0 = inlined_call_operand.vmem [shape: bf16[8,288], index: 0, kind: input, shape index: {}]   ;;  %s1458_s1 = inlined_call_operand.vmem [shape: bf16[8,12], index: 1, kind: input, shape index: {}]   ;;  %s1459_s2 = inlined_call_operand.vmem [shape: bf16[288,256], index: 2, kind: input, shape index: {}]   ;;  %s1460_s3 = inlined_call_operand.vmem [shape: bf16[12,256], index: 3, kind: input, shape index: {}]   ;;  %s1461_s4 = inlined_call_operand.vmem [shape: f32[1,256], index: 4, kind: input, shape index: {}]   ;;  %s1462_s5 = inlined_call_operand.vmem [shape: bf16[256,288], index: 5, kind: input, shape index: {}]   ;;  %s1463_s6 = inlined_call_operand.vmem [shape: f32[1,288], index: 6, kind: input, shape index: {}]   ;;  %s1464_s7 = inlined_call_operand.hbm [shape: f32[8,288], index: 7, kind: output, shape index: {}]  }
   0x1   :  { %v974_v0 = vld [vmem:[%s1459_s2 + $0x4] ss:$8 sps:$4 sm:$0xff]   ;;  %v976_v1 = vld [vmem:[%s1459_s2] ss:$8 sps:$4 sm:$0xff]   ;;  %120 = vmatprep.mubr.bf16.mxu0 %v1122_v2  ;;  %v977_v3 = vld [vmem:[%s1459_s2 + $0x14] ss:$8 sps:$4 sm:$0xff]  }
   0x2   :  { %323 = vmatprep.subr.bf16.mxu1 %v974_v0  ;;  %v979_v4 = vld [vmem:[%s1459_s2 + $0x10] ss:$8 sps:$4 sm:$0xff]   ;;  %v980_v5 = vld [vmem:[%s1459_s2 + $0x24] ss:$8 sps:$4 sm:$0xff]   ;;  %v982_v6 = vld [vmem:[%s1459_s2 + $0x20] ss:$8 sps:$4 sm:$0xff]  }
   0x3   :  { %324 = vmatpush1.bf16.msra.mxu1 %v976_v1  ;;  %v983_v7 = vld [vmem:[%s1459_s2 + $0x34] ss:$8 sps:$4 sm:$0xff]   ;;  %v985_v8 = vld [vmem:[%s1459_s2 + $0x30] ss:$8 sps:$4 sm:$0xff]   ;;  %v986_v9 = vld [vmem:[%s1459_s2 + $0x44] ss:$8 sps:$4 sm:$0xff]  }
   0x4   :  { %325 = vmatprep.subr.bf16.mxu1 %v977_v3  ;;  %v988_v10 = vld [vmem:[%s1459_s2 + $0x40] ss:$8 sps:$4 sm:$0xff]   ;;  %v989_v11 = vld [vmem:[%s1459_s2 + $0x54] ss:$8 sps:$4 sm:$0xff]   ;;  %v991_v14 = vld [vmem:[%s1459_s2 + $0x50] ss:$8 sps:$4 sm:$0xff]  }
   0x5   :  { %v1013_v12 = vld [vmem:[%s1460_s3 + $0x4] ss:$8 sps:$4 sm:$0x3f]   ;;  %v1015_v13 = vld [vmem:[%s1460_s3] ss:$8 sps:$4 sm:$0x3f]  }
   0x6   :  { %v992_v15 = vld [vmem:[%s1459_s2 + $0x64] ss:$8 sps:$4 sm:$0xff]   ;;  %860 = vmatprep.subr.msk.bf16.mxu0 %vm81_vm0, %v1013_v12  ;;  %v83_v16 = vsel %vm81_vm0, %v1015_v13, 0  ;;  %v66_v17 = vld [vmem:[%s1458_s1] sm:$0xf] }
   0x7   :  { %326 = vmatpush1.bf16.msra.mxu1 %v979_v4  ;;  %89 = vmatpush1.bf16.msra.mxu0 %v83_v16  ;;  %v1019_v18 = vld [vmem:[%s1459_s2 + $0x100] ss:$8 sps:$4 sm:$0xff]   ;;  %v1021_v19 = vld [vmem:[%s1459_s2 + $0x104] ss:$8 sps:$4 sm:$0xff]   ;;  %v995_v21 = vld [vmem:[%s1459_s2 + $0x74] ss:$8 sps:$4 sm:$0xff]  }
   0x8   :  { %327 = vmatprep.subr.bf16.mxu1 %v980_v5  ;;  %v994_v20 = vld [vmem:[%s1459_s2 + $0x60] ss:$8 sps:$4 sm:$0xff]   ;;  %364 = vmatprep.subr.bf16.mxu0 %v1021_v19  ;;  %v1027_v22 = vld [vmem:[%s1459_s2 + $0x114] ss:$8 sps:$4 sm:$0xff]   ;;  %v997_v23 = vld [vmem:[%s1459_s2 + $0x70] ss:$8 sps:$4 sm:$0xff]  }
   0x9   :  { %v1025_v24 = vld [vmem:[%s1459_s2 + $0x110] ss:$8 sps:$4 sm:$0xff]   ;;  %v998_v25 = vld [vmem:[%s1459_s2 + $0x84] ss:$8 sps:$4 sm:$0xff]   ;;  %v1033_v28 = vld [vmem:[%s1457_s0 + $0x8] ss:$0 sps:$4 sm:$0xff]  }
   0xa   :  { %861 = vmatmul.mubr.msk.bf16.vlgmr.msra.gmra.mrb[0].mxu0 %vm77_vm1, %v66_v17  ;;  %v1239_v26 = vld [vmem:[%s1457_s0] sm:$0xff]  ;;  %v1039_v31 = vld [vmem:[%s1462_s5 + $0x1c] ss:$12 sps:$4 sm:$0xff]   ;;  %v1003_v36 = vld [vmem:[%s1459_s2 + $0x90] ss:$8 sps:$4 sm:$0xff]  }
   0xb   :  { %328 = vmatpush1.bf16.msra.mxu1 %v982_v6  ;;  %365 = vmatpush1.bf16.msra.mxu0 %v1019_v18  ;;  %v863_v27 = vcombine.high %v1239_v26, %v1239_v26  ;;  %v1036_v29 = vld [vmem:[%s1462_s5 + $0x4] ss:$12 sps:$4 sm:$0xff]   ;;  %v1034_v30 = vld [vmem:[%s1462_s5] ss:$12 sps:$4 sm:$0xff]   ;;  %v1001_v33 = vld [vmem:[%s1459_s2 + $0x94] ss:$8 sps:$4 sm:$0xff]  }
   0xc   :  { %329 = vmatprep.subr.bf16.mxu1 %v983_v7  ;;  %396 = vmatprep.mubr.bf16.mxu0 %v1122_v2  ;;  %v1000_v32 = vld [vmem:[%s1459_s2 + $0x80] ss:$8 sps:$4 sm:$0xff]   ;;  %v1037_v34 = vld [vmem:[%s1462_s5 + $0x18] ss:$12 sps:$4 sm:$0xff]   ;;  %v1040_v38 = vld [vmem:[%s1462_s5 + $0x30] ss:$12 sps:$4 sm:$0xff]  }
   0xd   :  { %366 = vmatprep.subr.bf16.mxu0 %v1027_v22  ;;  %355 = vmatprep.mubr.bf16.mxu1 %v863_v27  ;;  %v1042_v35 = vld [vmem:[%s1462_s5 + $0x34] ss:$12 sps:$4 sm:$0xff]   ;;  %v1004_v37 = vld [vmem:[%s1459_s2 + $0xa4] ss:$8 sps:$4 sm:$0xff]   ;;  %v1009_v44 = vld [vmem:[%s1459_s2 + $0xb0] ss:$8 sps:$4 sm:$0xff]  }
   0xe   :  { %v1045_v39 = vld [vmem:[%s1462_s5 + $0x4c] ss:$12 sps:$4 sm:$0xff]   ;;  %v1006_v40 = vld [vmem:[%s1459_s2 + $0xa0] ss:$8 sps:$4 sm:$0xff]   ;;  %v1007_v41 = vld [vmem:[%s1459_s2 + $0xb4] ss:$8 sps:$4 sm:$0xff]  }
   0xf   :  { %330 = vmatpush1.bf16.msra.mxu1 %v985_v8  ;;  %367 = vmatpush1.bf16.msra.mxu0 %v1025_v24  ;;  %v1043_v42 = vld [vmem:[%s1462_s5 + $0x48] ss:$12 sps:$4 sm:$0xff]   ;;  %v1048_v43 = vld [vmem:[%s1462_s5 + $0x64] ss:$12 sps:$4 sm:$0xff]   ;;  %v1046_v47 = vld [vmem:[%s1462_s5 + $0x60] ss:$12 sps:$4 sm:$0xff]  }
  0x10   :  { %331 = vmatprep.subr.bf16.mxu1 %v986_v9  ;;  %760 = vmatprep.subr.bf16.mxu0 %v1036_v29  ;;  %v1010_v45 = vld [vmem:[%s1459_s2 + $0xc4] ss:$8 sps:$4 sm:$0xff]   ;;  %v1012_v46 = vld [vmem:[%s1459_s2 + $0xc0] ss:$8 sps:$4 sm:$0xff]   ;;  %v1016_v48 = vld [vmem:[%s1459_s2 + $0xd4] ss:$8 sps:$4 sm:$0xff]  }
  0x11   :  { %v1051_v49 = vld [vmem:[%s1462_s5 + $0x7c] ss:$12 sps:$4 sm:$0xff]   ;;  %v1049_v50 = vld [vmem:[%s1462_s5 + $0x78] ss:$12 sps:$4 sm:$0xff]   ;;  %v1054_v51 = vld [vmem:[%s1462_s5 + $0x94] ss:$12 sps:$4 sm:$0xff]  }
  0x12   :  { %901 = vmatmul.mubr.msk.bf16.vlgmr.msra.gmra.mrb[4].mxu0 %vm319_vm2, %v1033_v28  ;;  %v1018_v52 = vld [vmem:[%s1459_s2 + $0xd0] ss:$8 sps:$4 sm:$0xff]   ;;  %v1022_v53 = vld [vmem:[%s1459_s2 + $0xe4] ss:$8 sps:$4 sm:$0xff]   ;;  %v1024_v56 = vld [vmem:[%s1459_s2 + $0xe0] ss:$8 sps:$4 sm:$0xff]  }
  0x13   :  { %332 = vmatpush1.bf16.msra.mxu1 %v988_v10  ;;  %761 = vmatpush1.bf16.msra.mxu0 %v1034_v30  ;;  %v1052_v54 = vld [vmem:[%s1462_s5 + $0x90] ss:$12 sps:$4 sm:$0xff]   ;;  %v1057_v55 = vld [vmem:[%s1462_s5 + $0xac] ss:$12 sps:$4 sm:$0xff]   ;;  %v1055_v58 = vld [vmem:[%s1462_s5 + $0xa8] ss:$12 sps:$4 sm:$0xff]  }
  0x14   :  { %333 = vmatprep.subr.bf16.mxu1 %v989_v11  ;;  %762 = vmatprep.subr.bf16.mxu0 %v1039_v31  ;;  %v1028_v57 = vld [vmem:[%s1459_s2 + $0xf4] ss:$8 sps:$4 sm:$0xff]  }
  0x17   :  { %334 = vmatpush1.bf16.msra.mxu1 %v991_v14  ;;  %763 = vmatpush1.bf16.msra.mxu0 %v1037_v34 }
  0x18   :  { %335 = vmatprep.subr.bf16.mxu1 %v992_v15  ;;  %764 = vmatprep.subr.bf16.mxu0 %v1042_v35 }
  0x1b   :  { %336 = vmatpush1.bf16.msra.mxu1 %v994_v20  ;;  %765 = vmatpush1.bf16.msra.mxu0 %v1040_v38 }
  0x1c   :  { %337 = vmatprep.subr.bf16.mxu1 %v995_v21  ;;  %766 = vmatprep.subr.bf16.mxu0 %v1045_v39 }
  0x1f   :  { %338 = vmatpush1.bf16.msra.mxu1 %v997_v23  ;;  %767 = vmatpush1.bf16.msra.mxu0 %v1043_v42 }
  0x20   :  { %339 = vmatprep.subr.bf16.mxu1 %v998_v25  ;;  %768 = vmatprep.subr.bf16.mxu0 %v1048_v43 }
  0x23   :  { %340 = vmatpush1.bf16.msra.mxu1 %v1000_v32  ;;  %769 = vmatpush1.bf16.msra.mxu0 %v1046_v47 }
  0x24   :  { %341 = vmatprep.subr.bf16.mxu1 %v1001_v33  ;;  %770 = vmatprep.subr.bf16.mxu0 %v1051_v49 }
  0x27   :  { %342 = vmatpush1.bf16.msra.mxu1 %v1003_v36  ;;  %771 = vmatpush1.bf16.msra.mxu0 %v1049_v50 }
  0x28   :  { %343 = vmatprep.subr.bf16.mxu1 %v1004_v37  ;;  %772 = vmatprep.subr.bf16.mxu0 %v1054_v51 }
  0x2b   :  { %344 = vmatpush1.bf16.msra.mxu1 %v1006_v40  ;;  %773 = vmatpush1.bf16.msra.mxu0 %v1052_v54 }
  0x2c   :  { %345 = vmatprep.subr.bf16.mxu1 %v1007_v41 }
  0x2f   :  { %346 = vmatpush1.bf16.msra.mxu1 %v1009_v44 }
  0x30   :  { %347 = vmatprep.subr.bf16.mxu1 %v1010_v45 }
  0x33   :  { %348 = vmatpush1.bf16.msra.mxu1 %v1012_v46 }
  0x34   :  { %349 = vmatprep.subr.bf16.mxu1 %v1016_v48 }
  0x37   :  { %350 = vmatpush1.bf16.msra.mxu1 %v1018_v52 }
  0x38   :  { %351 = vmatprep.subr.bf16.mxu1 %v1022_v53 }
  0x39   :  { %12 = vsyncpa [#allocation3], 0  ;;  %774 = vmatprep.subr.bf16.mxu0 %v1057_v55  ;;  %v1060_v59 = vld [vmem:[%s1462_s5 + $0xc4] ss:$12 sps:$4 sm:$0xff]   ;;  %v1061_v61 = vld [vmem:[%s1462_s5 + $0xc8] ss:$12 sps:$4 sm:$0xff]   ;;  %v862_v63 = vcombine.low %v1239_v26, %v1239_v26  ;;  %v407_v37 = vlaneseq }
  0x3a   :  { %v1030_v60 = vld [vmem:[%s1459_s2 + $0xf0] ss:$8 sps:$4 sm:$0xff]   ;;  %775 = vmatpush1.bf16.msra.mxu0 %v1055_v58  ;;  %v1058_v62 = vld [vmem:[%s1462_s5 + $0xc0] ss:$12 sps:$4 sm:$0xff]   ;;  %v1065_v0 = vld [vmem:[%s1462_s5 + $0xdc] ss:$12 sps:$4 sm:$0xff]  }
  0x3b   :  { %352 = vmatpush1.bf16.msra.mxu1 %v1024_v56  ;;  %776 = vmatprep.subr.bf16.mxu0 %v1060_v59  ;;  %v1062_v1 = vld [vmem:[%s1462_s5 + $0x8] ss:$12 sps:$4 sm:$0xff]   ;;  %v1066_v2 = vld [vmem:[%s1462_s5 + $0xe0] ss:$12 sps:$4 sm:$0xff]   ;;  %v1063_v3 = vld [vmem:[%s1462_s5 + $0xd8] ss:$12 sps:$4 sm:$0xff]  }
  0x3c   :  { %353 = vmatprep.subr.bf16.mxu1 %v1028_v57  ;;  %v1070_v4 = vld [vmem:[%s1462_s5 + $0xf4] ss:$12 sps:$4 sm:$0xff]   ;;  %v1071_v6 = vld [vmem:[%s1462_s5 + $0xf8] ss:$12 sps:$4 sm:$0xff]   ;;  %v1068_v7 = vld [vmem:[%s1462_s5 + $0xf0] ss:$12 sps:$4 sm:$0xff]  }
  0x3d   :  { %v1067_v5 = vld [vmem:[%s1462_s5 + $0x20] ss:$12 sps:$4 sm:$0xff]   ;;  %v1072_v8 = vld [vmem:[%s1462_s5 + $0x38] ss:$12 sps:$4 sm:$0xff]   ;;  %v1073_v9 = vld [vmem:[%s1462_s5 + $0x108] ss:$12 sps:$4 sm:$0xff]  }
  0x3e   :  { %777 = vmatpush1.bf16.msra.mxu0 %v1058_v62  ;;  %v1075_v10 = vld [vmem:[%s1462_s5 + $0x10c] ss:$12 sps:$4 sm:$0xff]   ;;  %v1076_v11 = vld [vmem:[%s1462_s5 + $0x110] ss:$12 sps:$4 sm:$0xff]   ;;  %v1081_v14 = vld [vmem:[%s1462_s5 + $0x128] ss:$12 sps:$4 sm:$0xff]  }
  0x3f   :  { %354 = vmatpush1.bf16.msra.mxu1 %v1030_v60  ;;  %778 = vmatprep.subr.bf16.mxu0 %v1065_v0  ;;  %v1077_v12 = vld [vmem:[%s1462_s5 + $0x50] ss:$12 sps:$4 sm:$0xff]   ;;  %v1078_v15 = vld [vmem:[%s1462_s5 + $0x120] ss:$12 sps:$4 sm:$0xff]   ;;  %v1082_v16 = vld [vmem:[%s1462_s5 + $0x68] ss:$12 sps:$4 sm:$0xff]  }
  0x40   :  { %950 = vmatprep.subr.bf16.mxu1 %v1061_v61  ;;  %v1080_v13 = vld [vmem:[%s1462_s5 + $0x124] ss:$12 sps:$4 sm:$0xff]   ;;  %v1085_v17 = vld [vmem:[%s1462_s5 + $0x13c] ss:$12 sps:$4 sm:$0xff]   ;;  %v1086_v18 = vld [vmem:[%s1462_s5 + $0x140] ss:$12 sps:$4 sm:$0xff]  }
  0x41   :  { %v1083_v19 = vld [vmem:[%s1462_s5 + $0x138] ss:$12 sps:$4 sm:$0xff]   ;;  %v1087_v20 = vld [vmem:[%s1462_s5 + $0x80] ss:$12 sps:$4 sm:$0xff]   ;;  %v1088_v23 = vld [vmem:[%s1462_s5 + $0x150] ss:$12 sps:$4 sm:$0xff]  }
  0x42   :  { %356 = vmatmul.mubr.bf16.vlgmr.msra.gmra.mrb[0].mxu1 %v862_v63  ;;  %779 = vmatpush1.bf16.msra.mxu0 %v1063_v3  ;;  %v1090_v21 = vld [vmem:[%s1462_s5 + $0x154] ss:$12 sps:$4 sm:$0xff]   ;;  %v1091_v22 = vld [vmem:[%s1462_s5 + $0x158] ss:$12 sps:$4 sm:$0xff]   ;;  %v1096_v26 = vld [vmem:[%s1462_s5 + $0x170] ss:$12 sps:$4 sm:$0xff]  }
  0x43   :  { %951 = vmatpush3.bf16.msra.mxu1 %v1062_v1  ;;  %780 = vmatprep.subr.bf16.mxu0 %v1070_v4  ;;  %v1092_v24 = vld [vmem:[%s1462_s5 + $0x98] ss:$12 sps:$4 sm:$0xff]   ;;  %v1093_v27 = vld [vmem:[%s1462_s5 + $0x168] ss:$12 sps:$4 sm:$0xff]   ;;  %v1097_v28 = vld [vmem:[%s1462_s5 + $0xb0] ss:$12 sps:$4 sm:$0xff]  }
  0x44   :  { %952 = vmatprep.subr.bf16.mxu1 %v1066_v2  ;;  %v1095_v25 = vld [vmem:[%s1462_s5 + $0x16c] ss:$12 sps:$4 sm:$0xff]   ;;  %v408_v38 = vshrl.u32 %v407_v37, 7  ;;  %v405_v40 = vld [vmem:[%s1461_s4] sm:$0x3]  ;;  %s1123_s23 = smov [#allocation2]  }
  0x45   :  { %v487_v58 = vld [vmem:[%s1463_s6] sm:$0x7]  ;;  %s850_s24 = sshll.u32 %s1123_s23, 4  ;;  %s851_s24 = int_to_ptr.vmem [resolvable:$true] %s850_s24 }
  0x46   :  { %781 = vmatpush1.bf16.msra.mxu0 %v1068_v7  ;;  %v409_v39 = vsub.s32 0, %v408_v38  ;;  %v413_v41 = vsub.s32 1, %v408_v38  ;;  %v499_v59 = vsub.s32 2, %v408_v38  ;;  %s1098_s6 = scalar_lea.vmem %s851_s24, 384  ;;  %p1103_p1 = scmp.lt.s32.totalorder %s851_s24, %s851_s24 }
  0x47   :  { %953 = vmatpush3.bf16.msra.mxu1 %v1067_v5  ;;  %782 = vmatprep.subr.bf16.mxu0 %v1075_v10  ;;  %p1099_p0 = scmp.ne.s32.totalorder %s851_s24, %s1098_s6  ;;  %p1104_p2 = scmp.lt.s32.totalorder %s1098_s6, %s1098_s6 }
  0x48   :  { %954 = vmatprep.subr.bf16.mxu1 %v1071_v6  ;;  %v410_v44 = vrot.slane %v405_v40, %v409_v39  ;;  %v414_v47 = vrot.slane %v405_v40, %v413_v41  ;;  %v492_v60 = vrot.slane %v487_v58, %v409_v39  ;;  %v496_v61 = vrot.slane %v487_v58, %v413_v41 }
  0x49   :  { %v500_v0 = vrot.slane %v487_v58, %v499_v59  ;;  %p1105_p3 = por %p1104_p2, %p1103_p1 }
  0x4a   :  { %783 = vmatpush1.bf16.msra.mxu0 %v1073_v9 }
  0x4b   :  { %955 = vmatpush3.bf16.msra.mxu1 %v1072_v8  ;;  %784 = vmatprep.subr.bf16.mxu0 %v1080_v13  ;;  %p1106_p4 = pnand %p1105_p3, %p1099_p0 }
  0x4c   :  { %956 = vmatprep.subr.bf16.mxu1 %v1076_v11 }
  0x4e   :  { %785 = vmatpush1.bf16.msra.mxu0 %v1078_v15 }
  0x4f   :  { %957 = vmatpush3.bf16.msra.mxu1 %v1077_v12  ;;  %786 = vmatprep.subr.bf16.mxu0 %v1085_v17 }
  0x50   :  { %958 = vmatprep.subr.bf16.mxu1 %v1081_v14 }
  0x52   :  { %787 = vmatpush1.bf16.msra.mxu0 %v1083_v19 }
  0x53   :  { %959 = vmatpush3.bf16.msra.mxu1 %v1082_v16  ;;  %788 = vmatprep.subr.bf16.mxu0 %v1090_v21 }
  0x54   :  { %960 = vmatprep.subr.bf16.mxu1 %v1086_v18 }
  0x56   :  { %789 = vmatpush1.bf16.msra.mxu0 %v1088_v23 }
  0x57   :  { %961 = vmatpush3.bf16.msra.mxu1 %v1087_v20  ;;  %790 = vmatprep.subr.bf16.mxu0 %v1095_v25 }
  0x58   :  { %962 = vmatprep.subr.bf16.mxu1 %v1091_v22 }
  0x5a   :  { %791 = vmatpush1.bf16.msra.mxu0 %v1093_v27 }
  0x5b   :  { %963 = vmatpush3.bf16.msra.mxu1 %v1092_v24 }
  0x5c   :  { %964 = vmatprep.subr.bf16.mxu1 %v1096_v26 }
  0x5f   :  { %965 = vmatpush3.bf16.msra.mxu1 %v1097_v28 }
  0xdd   :  { %v122_v29 = vpop.f32.mrb[0].mxu0 }
  0xde   :  { %v124_v30 = vpop.f32.mrb[1].mxu0 }
  0xdf   :  { %v126_v31 = vpop.f32.mrb[2].mxu0 }
  0xe0   :  { %v127_v32 = vpop.f32.mrb[3].mxu0 }
  0xe5   :  { %v398_v33 = vpop.f32.mrb[4].mxu0 }
  0xe6   :  { %v400_v34 = vpop.f32.mrb[5].mxu0 }
  0xe7   :  { %v402_v35 = vpop.f32.mrb[6].mxu0 }
  0xe8   :  { %v403_v36 = vpop.f32.mrb[7].mxu0 }
 0x115   :  { %v357_v42 = vpop.f32.mrb[0].mxu1 }
 0x116   :  { %v358_v43 = vadd.f32 %v357_v42, %v122_v29  ;;  %v359_v45 = vpop.f32.mrb[1].mxu1 }
 0x117   :  { %v360_v46 = vadd.f32 %v359_v45, %v124_v30  ;;  %v361_v48 = vpop.f32.mrb[2].mxu1 }
 0x118   :  { %v399_v49 = vadd.f32 %v398_v33, %v358_v43  ;;  %v362_v50 = vpop.f32.mrb[3].mxu1 }
 0x119   :  { %v401_v51 = vadd.f32 %v400_v34, %v360_v46 }
 0x11a   :  { %v417_v52 = vadd.f32 %v410_v44, %v399_v49 }
 0x11b   :  { %v418_v53 = vadd.f32 %v414_v47, %v401_v51 }
 0x11c   :  { %v419_v54 = vmax.f32 %v417_v52, 0.0 }
 0x11d   :  { %v420_v55 = vmax.f32 %v418_v53, 0.0 }
 0x11e   :  { %v421_v57 = vpack.c.bf16 %v419_v54, %v419_v54 }
 0x11f   :  { %v422_v56 = vpack.c.bf16 %v420_v55, %v420_v55 }
 0x121   :  { %792 = vmatprep.mubr.bf16.mxu0 %v422_v56  ;;  %833 = vmatprep.mubr.bf16.mxu1 %v422_v56 }
 0x122   :  { %793 = vmatmul.mubr.bf16.vlgmr.msra.gmra.mrb[8].mxu0 %v421_v57  ;;  %834 = vmatmul.mubr.bf16.vlgmr.msra.gmra.mrb[4].mxu1 %v421_v57 }
 0x1f5   :  { %v794_v62 = vpop.f32.mrb[8].mxu0  ;;  %v966_v63 = vpop.f32.mrb[4].mxu1 }
 0x1f6   :  { %v795_v1 = vadd.f32 %v794_v62, %v492_v60  ;;  %v796_v2 = vpop.f32.mrb[9].mxu0  ;;  %v967_v3 = vpop.f32.mrb[5].mxu1 }
 0x1f7   :  { %v797_v4 = vadd.f32 %v796_v2, %v496_v61  ;;  %v968_v5 = vadd.f32 %v967_v3, %v966_v63  ;;  %v798_v6 = vpop.f32.mrb[10].mxu0  ;;  %v969_v7 = vpop.f32.mrb[6].mxu1 }
 0x1f8   :  { %841 = vst [vmem:[#allocation2] sm:$0xff] %v795_v1  ;;  %v799_v8 = vpop.f32.mrb[11].mxu0  ;;  %v970_v9 = vpop.f32.mrb[7].mxu1 }
 0x1f9   :  { %842 = vst [vmem:[#allocation2 + $0x8] sm:$0xff] %v797_v4  ;;  %v836_v10 = vadd.f32 %v968_v5, %v500_v0 }
 0x1fb   :  { %843 = vst.msk [vmem:[#allocation2 + $0x10] sm:$0xff] %vm319_vm2, %v836_v10 }
 0x1fc   :  { %1109 = shalt.err (!%p1106_p4)
}
 0x1fd   :  { %s1110_s27 = scalar_lea.hbm %s1464_s7, 384 }
 0x1fe   :  { %p1111_p5 = scmp.ne.s32.totalorder %s1464_s7, %s1110_s27  ;;  %p1114_p6 = scmp.lt.u32.totalorder %s1110_s27, %s1464_s7 }
 0x200   :  { %p1116_p7 = pnand %p1114_p6, %p1111_p5 }
 0x202   :  { %1119 = shalt.err (!%p1116_p7)
}
 0x203   :  { %853 = dma.vmem_to_hbm [thread:$0]  %s851_s24, 384, %s1464_s7, [#allocation3]  }
 0x204   :  { %1120 = dma.done.wait [#allocation3], 384  }
 0x205   :  { %1121 = vsyncadd [#allocation3], 4294966912 }
 0x206   :  { %857 = vsyncpa [#allocation3], 1 }

</bundles_post_ra>
